<compile_context>
chip_gen: v7x
topology: tpu7x:2x2x1
jax: 0.10.0
libtpu: 0.0.40
codegen_flags: <defaults>
</compile_context>

<pallas_src>
import jax
import jax.numpy as jnp
from jax import lax
from jax.experimental import pallas as pl
from jax.experimental.pallas import tpu as pltpu


def _round_up(x: int, m: int) -> int:
    return ((x + m - 1) // m) * m


def _slab_layout(H: int, NP: int):
    """Row offsets of each weight inside the packed (R, C) f32 slab.

    Every segment starts on an 8-row boundary (f32 sublane tile) so in-kernel
    static slices never straddle a tile boundary.
    """
    C = max(4 * H, NP)
    off = {}
    r = 0
    for name, rows in (("whh", H), ("w1", H), ("b1", 1),
                       ("w2", H), ("b2", 1), ("w3", H), ("b3", 1)):
        off[name] = r
        r = _round_up(r + rows, 8)
    return off, r, C


# ----------------------------- fused Pallas kernel --------------------------

def fused_predictor_kernel(tok_ref, gate_ref, len_ref, slab_ref, out_ref):
    """Whole forward pass in one kernel (no grid, everything VMEM/SMEM resident).

    tok_ref:  (T, B)      int32 token ids, SMEM (scalar reads drive the gather).
    gate_ref: (VOCAB, 4H) f32 gate pre-activation table
              (embedding @ W_ih^T + b_ih + b_hh), VMEM.
    len_ref:  (B, 1)      int32 per-task sequence lengths (PackedSequence).
    slab_ref: (R, C)      f32 packed weights (see _slab_layout).
    out_ref:  (B, NP)     f32 log-probabilities; pad lanes ~= -1e30.
    """
    T, B = tok_ref.shape
    G = gate_ref.shape[1]
    H = G // 4
    NP = out_ref.shape[1]
    off, R, C = _slab_layout(H, NP)
    assert slab_ref.shape == (R, C)

    # ---- hoisted, one-time loads; recurrent MXU operand cast to bf16 once ----
    whh = slab_ref[off["whh"]:off["whh"] + H, :G].astype(jnp.bfloat16)   # (H, 4H)
    lens = len_ref[...]                                                  # (B, 1) i32

    # ---- gather all T*B gate rows up front (vld work off the recurrent path) --
    xg = []
    for t in range(T):
        rows = [gate_ref[pl.ds(tok_ref[t, b], 1), :] for b in range(B)]
        xg.append(jnp.concatenate(rows, axis=0))                         # (B, 4H) f32

    # ---- LSTM recurrence: h/c in registers, fully unrolled (T small, static) --
    h = jnp.zeros((B, H), jnp.float32)
    c = jnp.zeros((B, H), jnp.float32)
    for t in range(T):
        # Only the recurrent matmul sits on the critical path (input projection
        # was folded into gate_table at prep time).  bf16 MXU inputs, f32 acc.
        gates = xg[t] + jnp.dot(h.astype(jnp.bfloat16), whh,
                                preferred_element_type=jnp.float32)      # (B, 4H)
        sig = jax.nn.sigmoid(gates)          # two full-vreg EUP ops per step
        th = jnp.tanh(gates)
        i = sig[:, 0 * H:1 * H]
        f = sig[:, 1 * H:2 * H]
        g = th[:, 2 * H:3 * H]
        o = sig[:, 3 * H:4 * H]
        c_new = f * c + i * g
        h_new = o * jnp.tanh(c_new)
        # PackedSequence semantics: freeze each task's state at its own length.
        upd = lens > t
        c = jnp.where(upd, c_new, c)
        h = jnp.where(upd, h_new, h)

    # ---- end = Linear -> ReLU -> Linear -> ReLU -------------------------------
    w1 = slab_ref[off["w1"]:off["w1"] + H, :H].astype(jnp.bfloat16)
    b1 = slab_ref[off["b1"]:off["b1"] + 1, :H]
    w2 = slab_ref[off["w2"]:off["w2"] + H, :H].astype(jnp.bfloat16)
    b2 = slab_ref[off["b2"]:off["b2"] + 1, :H]
    w3 = slab_ref[off["w3"]:off["w3"] + H, :NP].astype(jnp.bfloat16)
    b3 = slab_ref[off["b3"]:off["b3"] + 1, :NP]   # pad lanes baked to -1e30

    y = jnp.maximum(
        jnp.dot(h.astype(jnp.bfloat16), w1, preferred_element_type=jnp.float32) + b1, 0.0)
    y = jnp.maximum(
        jnp.dot(y.astype(jnp.bfloat16), w2, preferred_element_type=jnp.float32) + b2, 0.0)

    # ---- bigram layer + log_softmax (lane-padded; pad lanes stay ~ -1e30) -----
    logits = jnp.dot(y.astype(jnp.bfloat16), w3, preferred_element_type=jnp.float32) + b3
    m = jnp.max(logits, axis=-1, keepdims=True)
    z = logits - m
    lse = jnp.log(jnp.sum(jnp.exp(z), axis=-1, keepdims=True))
    out_ref[...] = z - lse
    # TODO(synk): GrammarPredictorLayer normalizes per-CFG-nonterminal rule groups
    # and mixes in a fixed variable_probability; modeled as one flat log_softmax
    # over all rules here (CFG structure not available in-script).


# ----------------------------- one-time parameter prep ----------------------

def prepare_params(params, lane: int = 128):
    """Parameter-only preprocessing.  Run ONCE at load time, not per call.

    Folds the LSTM input projection + bias into the embedding table, lane-pads
    the bigram layer (w3 pad cols = 0, b3 pad lanes = -1e30), and packs all
    small weights into a single f32 slab with 8-row-aligned segments.
    Note: when importing real PyTorch weights, b_ih_l0 + b_hh_l0 must BOTH be
    summed into the single b_lstm before folding.
    """
    H = params["w_hh_t"].shape[0]
    n_rules = params["w3"].shape[1]
    NP = max(_round_up(n_rules, lane), lane)
    gate_table = (params["embedding"].astype(jnp.float32) @ params["w_ih_t"]
                  + params["b_lstm"]).astype(jnp.float32)                # (VOCAB, 4H)

    off, R, C = _slab_layout(H, NP)
    pad = NP - n_rules
    pieces = {
        "whh": params["w_hh_t"],
        "w1": params["w1"], "b1": params["b1"],
        "w2": params["w2"], "b2": params["b2"],
        "w3": jnp.pad(params["w3"], ((0, 0), (0, pad))),
        "b3": jnp.pad(params["b3"], ((0, 0), (0, pad)), constant_values=-1e30),
    }
    slab = jnp.zeros((R, C), jnp.float32)
    for name, arr in pieces.items():
        r = off[name]
        slab = slab.at[r:r + arr.shape[0], :arr.shape[1]].set(arr.astype(jnp.float32))

    static = {"H": H, "n_rules": n_rules, "n_pad": NP}
    return jax.device_put(gate_table), jax.device_put(slab), static


# ----------------------------- wrapper ---------------------------------------

def make_my_predictor_forward(static):
    n_pad = static["n_pad"]

    @jax.jit
    def forward(tokens, lengths, gate_table, slab):
        """tokens: (T, B) int32 ids; lengths: (B,) int32.

        Returns the lane-padded (B, n_pad) log-prob buffer (pad lanes ~ -1e30);
        slice [:, :n_rules] only where actually consumed.
        """
        T, B = tokens.shape
        lens_col = lengths.astype(jnp.int32).reshape(B, 1)
        return pl.pallas_call(
            fused_predictor_kernel,
            out_shape=jax.ShapeDtypeStruct((B, n_pad), jnp.float32),
            in_specs=[
                pl.BlockSpec(memory_space=pltpu.MemorySpace.SMEM),   # tokens (scalar reads)
                pl.BlockSpec(memory_space=pltpu.MemorySpace.VMEM),   # gate_table
                pl.BlockSpec(memory_space=pltpu.MemorySpace.VMEM),   # lengths
                pl.BlockSpec(memory_space=pltpu.MemorySpace.VMEM),   # packed weight slab
            ],
            out_specs=pl.BlockSpec(memory_space=pltpu.MemorySpace.VMEM),
            # No grid: total footprint < 100 KB, everything VMEM-resident.
            # A batch-parallel grid (v7x dual-TC) only pays off at B in the hundreds.
        )(tokens, gate_table, lens_col, slab)

    return forward


# ----------------------------- reference (pure JAX, f32) ----------------------

def reference_forward(tokens, lengths, params):
    x_emb = jnp.take(params["embedding"], tokens, axis=0)  # (T, B, H)
    T, B, H = x_emb.shape

    def step(carry, inp):
        h, c = carry
        x_t, t = inp
        gates = x_t @ params["w_ih_t"] + h @ params["w_hh_t"] + params["b_lstm"]
        i = jax.nn.sigmoid(gates[:, 0 * H:1 * H])
        f = jax.nn.sigmoid(gates[:, 1 * H:2 * H])
        g = jnp.tanh(gates[:, 2 * H:3 * H])
        o = jax.nn.sigmoid(gates[:, 3 * H:4 * H])
        c_new = f * c + i * g
        h_new = o * jnp.tanh(c_new)
        upd = (lengths > t)[:, None]
        h = jnp.where(upd, h_new, h)
        c = jnp.where(upd, c_new, c)
        return (h, c), None

    init = (jnp.zeros((B, H)), jnp.zeros((B, H)))
    (h, _), _ = lax.scan(step, init, (x_emb, jnp.arange(T)))
    y = jnp.maximum(h @ params["w1"] + params["b1"], 0.0)
    y = jnp.maximum(y @ params["w2"] + params["b2"], 0.0)
    logits = y @ params["w3"] + params["b3"]
    return jax.nn.log_softmax(logits, axis=-1)


# ----------------------------- main ------------------------------------------

if __name__ == "__main__":
    SIZE = 32          # hidden size ("size" arg of MyPredictor)
    T = 8              # encoded task sequence length (max)
    B = 2              # batch of tasks
    VOCAB = 20         # len(encoder.lexicon)
    N_RULES = 64       # number of bigram grammar rules predicted

    key = jax.random.PRNGKey(0)
    keys = jax.random.split(key, 10)
    scale = 0.1

    params = {
        "embedding": scale * jax.random.normal(keys[0], (VOCAB, SIZE), jnp.float32),
        # PyTorch LSTM weights are (4H, H); we store their transposes (H, 4H).
        "w_ih_t": scale * jax.random.normal(keys[1], (SIZE, 4 * SIZE), jnp.float32),
        "w_hh_t": scale * jax.random.normal(keys[2], (SIZE, 4 * SIZE), jnp.float32),
        "b_lstm": scale * jax.random.normal(keys[3], (1, 4 * SIZE), jnp.float32),
        "w1": scale * jax.random.normal(keys[4], (SIZE, SIZE), jnp.float32),
        "b1": scale * jax.random.normal(keys[5], (1, SIZE), jnp.float32),
        "w2": scale * jax.random.normal(keys[6], (SIZE, SIZE), jnp.float32),
        "b2": scale * jax.random.normal(keys[7], (1, SIZE), jnp.float32),
        "w3": scale * jax.random.normal(keys[8], (SIZE, N_RULES), jnp.float32),
        "b3": scale * jax.random.normal(keys[9], (1, N_RULES), jnp.float32),
    }

    tokens = jax.random.randint(jax.random.PRNGKey(42), (T, B), 0, VOCAB, jnp.int32)
    # Variable-length tasks (PackedSequence): task 0 uses all 8 steps, task 1 only 5.
    lengths = jnp.array([T, 5], dtype=jnp.int32)

    # One-time parameter prep (outside the per-call path).
    gate_table, slab, static = prepare_params(params)
    forward = make_my_predictor_forward(static)

    out_padded = forward(tokens, lengths, gate_table, slab)
    out_padded = jax.block_until_ready(out_padded)
    # Slice to n_rules only at the point of consumption (here: the check).
    out = out_padded[:, :static["n_rules"]]

    ref = jax.block_until_ready(reference_forward(tokens, lengths, params))
    assert out.shape == (B, N_RULES)
    # bf16 MXU operands vs. the pure-f32 reference -> tolerance 2e-3.
    assert jnp.allclose(out, ref, atol=2e-3, rtol=2e-3), "mismatch vs JAX reference"
    assert jnp.all(jnp.isfinite(out)), "non-finite values in real rule lanes"

    print("KERNEL_OK")
</pallas_src>

<mosaic_0001>
module attributes {stable_mosaic.version = 11 : i64} {
  func.func @fused_predictor_kernel(%arg0: memref<8x2xi32, #tpu.memory_space<smem>>, %arg1: memref<20x128xf32, #tpu.memory_space<vmem>>, %arg2: memref<2x1xi32, #tpu.memory_space<vmem>>, %arg3: memref<152x128xf32, #tpu.memory_space<vmem>>, %arg4: memref<2x128xf32, #tpu.memory_space<vmem>>) attributes {dimension_semantics = [], scalar_prefetch = 0 : i64, scratch_operands = 0 : i64, tpu.core_type = #tpu.core_type<tc>} {
    %c0 = arith.constant 0 : index
    %c0_0 = arith.constant 0 : index
    %0 = vector.load %arg3[%c0, %c0_0] : memref<152x128xf32, #tpu.memory_space<vmem>>, vector<32x128xf32>
    %1 = arith.truncf %0 : vector<32x128xf32> to vector<32x128xbf16>
    %c0_1 = arith.constant 0 : index
    %c0_2 = arith.constant 0 : index
    %2 = vector.load %arg2[%c0_1, %c0_2] : memref<2x1xi32, #tpu.memory_space<vmem>>, vector<2x1xi32>
    %c0_3 = arith.constant 0 : index
    %c0_4 = arith.constant 0 : index
    %3 = memref.load %arg0[%c0_3, %c0_4] : memref<8x2xi32, #tpu.memory_space<smem>>
    %4 = arith.index_cast %3 : i32 to index
    %c0_5 = arith.constant 0 : index
    %5 = vector.load %arg1[%4, %c0_5] : memref<20x128xf32, #tpu.memory_space<vmem>>, vector<1x128xf32>
    %c0_6 = arith.constant 0 : index
    %c1 = arith.constant 1 : index
    %6 = memref.load %arg0[%c0_6, %c1] : memref<8x2xi32, #tpu.memory_space<smem>>
    %7 = arith.index_cast %6 : i32 to index
    %c0_7 = arith.constant 0 : index
    %8 = vector.load %arg1[%7, %c0_7] : memref<20x128xf32, #tpu.memory_space<vmem>>, vector<1x128xf32>
    %9 = tpu.concatenate %5, %8 in 0 : vector<1x128xf32>, vector<1x128xf32> -> vector<2x128xf32>
    %c1_8 = arith.constant 1 : index
    %c0_9 = arith.constant 0 : index
    %10 = memref.load %arg0[%c1_8, %c0_9] : memref<8x2xi32, #tpu.memory_space<smem>>
    %11 = arith.index_cast %10 : i32 to index
    %c0_10 = arith.constant 0 : index
    %12 = vector.load %arg1[%11, %c0_10] : memref<20x128xf32, #tpu.memory_space<vmem>>, vector<1x128xf32>
    %c1_11 = arith.constant 1 : index
    %c1_12 = arith.constant 1 : index
    %13 = memref.load %arg0[%c1_11, %c1_12] : memref<8x2xi32, #tpu.memory_space<smem>>
    %14 = arith.index_cast %13 : i32 to index
    %c0_13 = arith.constant 0 : index
    %15 = vector.load %arg1[%14, %c0_13] : memref<20x128xf32, #tpu.memory_space<vmem>>, vector<1x128xf32>
    %16 = tpu.concatenate %12, %15 in 0 : vector<1x128xf32>, vector<1x128xf32> -> vector<2x128xf32>
    %c2 = arith.constant 2 : index
    %c0_14 = arith.constant 0 : index
    %17 = memref.load %arg0[%c2, %c0_14] : memref<8x2xi32, #tpu.memory_space<smem>>
    %18 = arith.index_cast %17 : i32 to index
    %c0_15 = arith.constant 0 : index
    %19 = vector.load %arg1[%18, %c0_15] : memref<20x128xf32, #tpu.memory_space<vmem>>, vector<1x128xf32>
    %c2_16 = arith.constant 2 : index
    %c1_17 = arith.constant 1 : index
    %20 = memref.load %arg0[%c2_16, %c1_17] : memref<8x2xi32, #tpu.memory_space<smem>>
    %21 = arith.index_cast %20 : i32 to index
    %c0_18 = arith.constant 0 : index
    %22 = vector.load %arg1[%21, %c0_18] : memref<20x128xf32, #tpu.memory_space<vmem>>, vector<1x128xf32>
    %23 = tpu.concatenate %19, %22 in 0 : vector<1x128xf32>, vector<1x128xf32> -> vector<2x128xf32>
    %c3 = arith.constant 3 : index
    %c0_19 = arith.constant 0 : index
    %24 = memref.load %arg0[%c3, %c0_19] : memref<8x2xi32, #tpu.memory_space<smem>>
    %25 = arith.index_cast %24 : i32 to index
    %c0_20 = arith.constant 0 : index
    %26 = vector.load %arg1[%25, %c0_20] : memref<20x128xf32, #tpu.memory_space<vmem>>, vector<1x128xf32>
    %c3_21 = arith.constant 3 : index
    %c1_22 = arith.constant 1 : index
    %27 = memref.load %arg0[%c3_21, %c1_22] : memref<8x2xi32, #tpu.memory_space<smem>>
    %28 = arith.index_cast %27 : i32 to index
    %c0_23 = arith.constant 0 : index
    %29 = vector.load %arg1[%28, %c0_23] : memref<20x128xf32, #tpu.memory_space<vmem>>, vector<1x128xf32>
    %30 = tpu.concatenate %26, %29 in 0 : vector<1x128xf32>, vector<1x128xf32> -> vector<2x128xf32>
    %c4 = arith.constant 4 : index
    %c0_24 = arith.constant 0 : index
    %31 = memref.load %arg0[%c4, %c0_24] : memref<8x2xi32, #tpu.memory_space<smem>>
    %32 = arith.index_cast %31 : i32 to index
    %c0_25 = arith.constant 0 : index
    %33 = vector.load %arg1[%32, %c0_25] : memref<20x128xf32, #tpu.memory_space<vmem>>, vector<1x128xf32>
    %c4_26 = arith.constant 4 : index
    %c1_27 = arith.constant 1 : index
    %34 = memref.load %arg0[%c4_26, %c1_27] : memref<8x2xi32, #tpu.memory_space<smem>>
    %35 = arith.index_cast %34 : i32 to index
    %c0_28 = arith.constant 0 : index
    %36 = vector.load %arg1[%35, %c0_28] : memref<20x128xf32, #tpu.memory_space<vmem>>, vector<1x128xf32>
    %37 = tpu.concatenate %33, %36 in 0 : vector<1x128xf32>, vector<1x128xf32> -> vector<2x128xf32>
    %c5 = arith.constant 5 : index
    %c0_29 = arith.constant 0 : index
    %38 = memref.load %arg0[%c5, %c0_29] : memref<8x2xi32, #tpu.memory_space<smem>>
    %39 = arith.index_cast %38 : i32 to index
    %c0_30 = arith.constant 0 : index
    %40 = vector.load %arg1[%39, %c0_30] : memref<20x128xf32, #tpu.memory_space<vmem>>, vector<1x128xf32>
    %c5_31 = arith.constant 5 : index
    %c1_32 = arith.constant 1 : index
    %41 = memref.load %arg0[%c5_31, %c1_32] : memref<8x2xi32, #tpu.memory_space<smem>>
    %42 = arith.index_cast %41 : i32 to index
    %c0_33 = arith.constant 0 : index
    %43 = vector.load %arg1[%42, %c0_33] : memref<20x128xf32, #tpu.memory_space<vmem>>, vector<1x128xf32>
    %44 = tpu.concatenate %40, %43 in 0 : vector<1x128xf32>, vector<1x128xf32> -> vector<2x128xf32>
    %c6 = arith.constant 6 : index
    %c0_34 = arith.constant 0 : index
    %45 = memref.load %arg0[%c6, %c0_34] : memref<8x2xi32, #tpu.memory_space<smem>>
    %46 = arith.index_cast %45 : i32 to index
    %c0_35 = arith.constant 0 : index
    %47 = vector.load %arg1[%46, %c0_35] : memref<20x128xf32, #tpu.memory_space<vmem>>, vector<1x128xf32>
    %c6_36 = arith.constant 6 : index
    %c1_37 = arith.constant 1 : index
    %48 = memref.load %arg0[%c6_36, %c1_37] : memref<8x2xi32, #tpu.memory_space<smem>>
    %49 = arith.index_cast %48 : i32 to index
    %c0_38 = arith.constant 0 : index
    %50 = vector.load %arg1[%49, %c0_38] : memref<20x128xf32, #tpu.memory_space<vmem>>, vector<1x128xf32>
    %51 = tpu.concatenate %47, %50 in 0 : vector<1x128xf32>, vector<1x128xf32> -> vector<2x128xf32>
    %c7 = arith.constant 7 : index
    %c0_39 = arith.constant 0 : index
    %52 = memref.load %arg0[%c7, %c0_39] : memref<8x2xi32, #tpu.memory_space<smem>>
    %53 = arith.index_cast %52 : i32 to index
    %c0_40 = arith.constant 0 : index
    %54 = vector.load %arg1[%53, %c0_40] : memref<20x128xf32, #tpu.memory_space<vmem>>, vector<1x128xf32>
    %c7_41 = arith.constant 7 : index
    %c1_42 = arith.constant 1 : index
    %55 = memref.load %arg0[%c7_41, %c1_42] : memref<8x2xi32, #tpu.memory_space<smem>>
    %56 = arith.index_cast %55 : i32 to index
    %c0_43 = arith.constant 0 : index
    %57 = vector.load %arg1[%56, %c0_43] : memref<20x128xf32, #tpu.memory_space<vmem>>, vector<1x128xf32>
    %58 = tpu.concatenate %54, %57 in 0 : vector<1x128xf32>, vector<1x128xf32> -> vector<2x128xf32>
    %cst = arith.constant 0.000000e+00 : f32
    %59 = vector.broadcast %cst : f32 to vector<2x32xf32>
    %cst_44 = arith.constant 0.000000e+00 : f32
    %60 = vector.broadcast %cst_44 : f32 to vector<2x32xf32>
    %61 = arith.truncf %59 : vector<2x32xf32> to vector<2x32xbf16>
    %cst_45 = arith.constant dense<0.000000e+00> : vector<2x128xf32>
    %62 = tpu.matmul %61, %1, %cst_45 {dimension_numbers = #tpu.dot_dimension_numbers<[1], [0], [0], [1], [0, 0, 1, 1], [], []>} : vector<2x32xbf16>, vector<32x128xbf16>, vector<2x128xf32> -> vector<2x128xf32>
    %63 = arith.addf %9, %62 : vector<2x128xf32>
    %64 = arith.negf %63 : vector<2x128xf32>
    %65 = math.exp %64 : vector<2x128xf32>
    %cst_46 = arith.constant 1.000000e+00 : f32
    %66 = vector.broadcast %cst_46 : f32 to vector<2x128xf32>
    %67 = arith.addf %66, %65 : vector<2x128xf32>
    %68 = arith.divf %66, %67 : vector<2x128xf32>
    %69 = math.tanh %63 : vector<2x128xf32>
    %70 = vector.extract_strided_slice %68 {offsets = [0, 0], sizes = [2, 32], strides = [1, 1]} : vector<2x128xf32> to vector<2x32xf32>
    %71 = vector.extract_strided_slice %68 {offsets = [0, 32], sizes = [2, 32], strides = [1, 1]} : vector<2x128xf32> to vector<2x32xf32>
    %72 = vector.extract_strided_slice %69 {offsets = [0, 64], sizes = [2, 32], strides = [1, 1]} : vector<2x128xf32> to vector<2x32xf32>
    %73 = vector.extract_strided_slice %68 {offsets = [0, 96], sizes = [2, 32], strides = [1, 1]} : vector<2x128xf32> to vector<2x32xf32>
    %74 = arith.mulf %71, %60 : vector<2x32xf32>
    %75 = arith.mulf %70, %72 : vector<2x32xf32>
    %76 = arith.addf %74, %75 : vector<2x32xf32>
    %77 = math.tanh %76 : vector<2x32xf32>
    %78 = arith.mulf %73, %77 : vector<2x32xf32>
    %c0_i32 = arith.constant 0 : i32
    %79 = vector.broadcast %c0_i32 : i32 to vector<2x1xi32>
    %80 = arith.cmpi sgt, %2, %79 : vector<2x1xi32>
    %81 = vector.shape_cast %80 : vector<2x1xi1> to vector<2x1xi1>
    %82 = vector.broadcast %81 : vector<2x1xi1> to vector<2x32xi1>
    %83 = arith.select %82, %76, %60 : vector<2x32xi1>, vector<2x32xf32>
    %84 = vector.shape_cast %80 : vector<2x1xi1> to vector<2x1xi1>
    %85 = vector.broadcast %84 : vector<2x1xi1> to vector<2x32xi1>
    %86 = arith.select %85, %78, %59 : vector<2x32xi1>, vector<2x32xf32>
    %87 = arith.truncf %86 : vector<2x32xf32> to vector<2x32xbf16>
    %cst_47 = arith.constant dense<0.000000e+00> : vector<2x128xf32>
    %88 = tpu.matmul %87, %1, %cst_47 {dimension_numbers = #tpu.dot_dimension_numbers<[1], [0], [0], [1], [0, 0, 1, 1], [], []>} : vector<2x32xbf16>, vector<32x128xbf16>, vector<2x128xf32> -> vector<2x128xf32>
    %89 = arith.addf %16, %88 : vector<2x128xf32>
    %90 = arith.negf %89 : vector<2x128xf32>
    %91 = math.exp %90 : vector<2x128xf32>
    %cst_48 = arith.constant 1.000000e+00 : f32
    %92 = vector.broadcast %cst_48 : f32 to vector<2x128xf32>
    %93 = arith.addf %92, %91 : vector<2x128xf32>
    %94 = arith.divf %92, %93 : vector<2x128xf32>
    %95 = math.tanh %89 : vector<2x128xf32>
    %96 = vector.extract_strided_slice %94 {offsets = [0, 0], sizes = [2, 32], strides = [1, 1]} : vector<2x128xf32> to vector<2x32xf32>
    %97 = vector.extract_strided_slice %94 {offsets = [0, 32], sizes = [2, 32], strides = [1, 1]} : vector<2x128xf32> to vector<2x32xf32>
    %98 = vector.extract_strided_slice %95 {offsets = [0, 64], sizes = [2, 32], strides = [1, 1]} : vector<2x128xf32> to vector<2x32xf32>
    %99 = vector.extract_strided_slice %94 {offsets = [0, 96], sizes = [2, 32], strides = [1, 1]} : vector<2x128xf32> to vector<2x32xf32>
    %100 = arith.mulf %97, %83 : vector<2x32xf32>
    %101 = arith.mulf %96, %98 : vector<2x32xf32>
    %102 = arith.addf %100, %101 : vector<2x32xf32>
    %103 = math.tanh %102 : vector<2x32xf32>
    %104 = arith.mulf %99, %103 : vector<2x32xf32>
    %c1_i32 = arith.constant 1 : i32
    %105 = vector.broadcast %c1_i32 : i32 to vector<2x1xi32>
    %106 = arith.cmpi sgt, %2, %105 : vector<2x1xi32>
    %107 = vector.shape_cast %106 : vector<2x1xi1> to vector<2x1xi1>
    %108 = vector.broadcast %107 : vector<2x1xi1> to vector<2x32xi1>
    %109 = arith.select %108, %102, %83 : vector<2x32xi1>, vector<2x32xf32>
    %110 = vector.shape_cast %106 : vector<2x1xi1> to vector<2x1xi1>
    %111 = vector.broadcast %110 : vector<2x1xi1> to vector<2x32xi1>
    %112 = arith.select %111, %104, %86 : vector<2x32xi1>, vector<2x32xf32>
    %113 = arith.truncf %112 : vector<2x32xf32> to vector<2x32xbf16>
    %cst_49 = arith.constant dense<0.000000e+00> : vector<2x128xf32>
    %114 = tpu.matmul %113, %1, %cst_49 {dimension_numbers = #tpu.dot_dimension_numbers<[1], [0], [0], [1], [0, 0, 1, 1], [], []>} : vector<2x32xbf16>, vector<32x128xbf16>, vector<2x128xf32> -> vector<2x128xf32>
    %115 = arith.addf %23, %114 : vector<2x128xf32>
    %116 = arith.negf %115 : vector<2x128xf32>
    %117 = math.exp %116 : vector<2x128xf32>
    %cst_50 = arith.constant 1.000000e+00 : f32
    %118 = vector.broadcast %cst_50 : f32 to vector<2x128xf32>
    %119 = arith.addf %118, %117 : vector<2x128xf32>
    %120 = arith.divf %118, %119 : vector<2x128xf32>
    %121 = math.tanh %115 : vector<2x128xf32>
    %122 = vector.extract_strided_slice %120 {offsets = [0, 0], sizes = [2, 32], strides = [1, 1]} : vector<2x128xf32> to vector<2x32xf32>
    %123 = vector.extract_strided_slice %120 {offsets = [0, 32], sizes = [2, 32], strides = [1, 1]} : vector<2x128xf32> to vector<2x32xf32>
    %124 = vector.extract_strided_slice %121 {offsets = [0, 64], sizes = [2, 32], strides = [1, 1]} : vector<2x128xf32> to vector<2x32xf32>
    %125 = vector.extract_strided_slice %120 {offsets = [0, 96], sizes = [2, 32], strides = [1, 1]} : vector<2x128xf32> to vector<2x32xf32>
    %126 = arith.mulf %123, %109 : vector<2x32xf32>
    %127 = arith.mulf %122, %124 : vector<2x32xf32>
    %128 = arith.addf %126, %127 : vector<2x32xf32>
    %129 = math.tanh %128 : vector<2x32xf32>
    %130 = arith.mulf %125, %129 : vector<2x32xf32>
    %c2_i32 = arith.constant 2 : i32
    %131 = vector.broadcast %c2_i32 : i32 to vector<2x1xi32>
    %132 = arith.cmpi sgt, %2, %131 : vector<2x1xi32>
    %133 = vector.shape_cast %132 : vector<2x1xi1> to vector<2x1xi1>
    %134 = vector.broadcast %133 : vector<2x1xi1> to vector<2x32xi1>
    %135 = arith.select %134, %128, %109 : vector<2x32xi1>, vector<2x32xf32>
    %136 = vector.shape_cast %132 : vector<2x1xi1> to vector<2x1xi1>
    %137 = vector.broadcast %136 : vector<2x1xi1> to vector<2x32xi1>
    %138 = arith.select %137, %130, %112 : vector<2x32xi1>, vector<2x32xf32>
    %139 = arith.truncf %138 : vector<2x32xf32> to vector<2x32xbf16>
    %cst_51 = arith.constant dense<0.000000e+00> : vector<2x128xf32>
    %140 = tpu.matmul %139, %1, %cst_51 {dimension_numbers = #tpu.dot_dimension_numbers<[1], [0], [0], [1], [0, 0, 1, 1], [], []>} : vector<2x32xbf16>, vector<32x128xbf16>, vector<2x128xf32> -> vector<2x128xf32>
    %141 = arith.addf %30, %140 : vector<2x128xf32>
    %142 = arith.negf %141 : vector<2x128xf32>
    %143 = math.exp %142 : vector<2x128xf32>
    %cst_52 = arith.constant 1.000000e+00 : f32
    %144 = vector.broadcast %cst_52 : f32 to vector<2x128xf32>
    %145 = arith.addf %144, %143 : vector<2x128xf32>
    %146 = arith.divf %144, %145 : vector<2x128xf32>
    %147 = math.tanh %141 : vector<2x128xf32>
    %148 = vector.extract_strided_slice %146 {offsets = [0, 0], sizes = [2, 32], strides = [1, 1]} : vector<2x128xf32> to vector<2x32xf32>
    %149 = vector.extract_strided_slice %146 {offsets = [0, 32], sizes = [2, 32], strides = [1, 1]} : vector<2x128xf32> to vector<2x32xf32>
    %150 = vector.extract_strided_slice %147 {offsets = [0, 64], sizes = [2, 32], strides = [1, 1]} : vector<2x128xf32> to vector<2x32xf32>
    %151 = vector.extract_strided_slice %146 {offsets = [0, 96], sizes = [2, 32], strides = [1, 1]} : vector<2x128xf32> to vector<2x32xf32>
    %152 = arith.mulf %149, %135 : vector<2x32xf32>
    %153 = arith.mulf %148, %150 : vector<2x32xf32>
    %154 = arith.addf %152, %153 : vector<2x32xf32>
    %155 = math.tanh %154 : vector<2x32xf32>
    %156 = arith.mulf %151, %155 : vector<2x32xf32>
    %c3_i32 = arith.constant 3 : i32
    %157 = vector.broadcast %c3_i32 : i32 to vector<2x1xi32>
    %158 = arith.cmpi sgt, %2, %157 : vector<2x1xi32>
    %159 = vector.shape_cast %158 : vector<2x1xi1> to vector<2x1xi1>
    %160 = vector.broadcast %159 : vector<2x1xi1> to vector<2x32xi1>
    %161 = arith.select %160, %154, %135 : vector<2x32xi1>, vector<2x32xf32>
    %162 = vector.shape_cast %158 : vector<2x1xi1> to vector<2x1xi1>
    %163 = vector.broadcast %162 : vector<2x1xi1> to vector<2x32xi1>
    %164 = arith.select %163, %156, %138 : vector<2x32xi1>, vector<2x32xf32>
    %165 = arith.truncf %164 : vector<2x32xf32> to vector<2x32xbf16>
    %cst_53 = arith.constant dense<0.000000e+00> : vector<2x128xf32>
    %166 = tpu.matmul %165, %1, %cst_53 {dimension_numbers = #tpu.dot_dimension_numbers<[1], [0], [0], [1], [0, 0, 1, 1], [], []>} : vector<2x32xbf16>, vector<32x128xbf16>, vector<2x128xf32> -> vector<2x128xf32>
    %167 = arith.addf %37, %166 : vector<2x128xf32>
    %168 = arith.negf %167 : vector<2x128xf32>
    %169 = math.exp %168 : vector<2x128xf32>
    %cst_54 = arith.constant 1.000000e+00 : f32
    %170 = vector.broadcast %cst_54 : f32 to vector<2x128xf32>
    %171 = arith.addf %170, %169 : vector<2x128xf32>
    %172 = arith.divf %170, %171 : vector<2x128xf32>
    %173 = math.tanh %167 : vector<2x128xf32>
    %174 = vector.extract_strided_slice %172 {offsets = [0, 0], sizes = [2, 32], strides = [1, 1]} : vector<2x128xf32> to vector<2x32xf32>
    %175 = vector.extract_strided_slice %172 {offsets = [0, 32], sizes = [2, 32], strides = [1, 1]} : vector<2x128xf32> to vector<2x32xf32>
    %176 = vector.extract_strided_slice %173 {offsets = [0, 64], sizes = [2, 32], strides = [1, 1]} : vector<2x128xf32> to vector<2x32xf32>
    %177 = vector.extract_strided_slice %172 {offsets = [0, 96], sizes = [2, 32], strides = [1, 1]} : vector<2x128xf32> to vector<2x32xf32>
    %178 = arith.mulf %175, %161 : vector<2x32xf32>
    %179 = arith.mulf %174, %176 : vector<2x32xf32>
    %180 = arith.addf %178, %179 : vector<2x32xf32>
    %181 = math.tanh %180 : vector<2x32xf32>
    %182 = arith.mulf %177, %181 : vector<2x32xf32>
    %c4_i32 = arith.constant 4 : i32
    %183 = vector.broadcast %c4_i32 : i32 to vector<2x1xi32>
    %184 = arith.cmpi sgt, %2, %183 : vector<2x1xi32>
    %185 = vector.shape_cast %184 : vector<2x1xi1> to vector<2x1xi1>
    %186 = vector.broadcast %185 : vector<2x1xi1> to vector<2x32xi1>
    %187 = arith.select %186, %180, %161 : vector<2x32xi1>, vector<2x32xf32>
    %188 = vector.shape_cast %184 : vector<2x1xi1> to vector<2x1xi1>
    %189 = vector.broadcast %188 : vector<2x1xi1> to vector<2x32xi1>
    %190 = arith.select %189, %182, %164 : vector<2x32xi1>, vector<2x32xf32>
    %191 = arith.truncf %190 : vector<2x32xf32> to vector<2x32xbf16>
    %cst_55 = arith.constant dense<0.000000e+00> : vector<2x128xf32>
    %192 = tpu.matmul %191, %1, %cst_55 {dimension_numbers = #tpu.dot_dimension_numbers<[1], [0], [0], [1], [0, 0, 1, 1], [], []>} : vector<2x32xbf16>, vector<32x128xbf16>, vector<2x128xf32> -> vector<2x128xf32>
    %193 = arith.addf %44, %192 : vector<2x128xf32>
    %194 = arith.negf %193 : vector<2x128xf32>
    %195 = math.exp %194 : vector<2x128xf32>
    %cst_56 = arith.constant 1.000000e+00 : f32
    %196 = vector.broadcast %cst_56 : f32 to vector<2x128xf32>
    %197 = arith.addf %196, %195 : vector<2x128xf32>
    %198 = arith.divf %196, %197 : vector<2x128xf32>
    %199 = math.tanh %193 : vector<2x128xf32>
    %200 = vector.extract_strided_slice %198 {offsets = [0, 0], sizes = [2, 32], strides = [1, 1]} : vector<2x128xf32> to vector<2x32xf32>
    %201 = vector.extract_strided_slice %198 {offsets = [0, 32], sizes = [2, 32], strides = [1, 1]} : vector<2x128xf32> to vector<2x32xf32>
    %202 = vector.extract_strided_slice %199 {offsets = [0, 64], sizes = [2, 32], strides = [1, 1]} : vector<2x128xf32> to vector<2x32xf32>
    %203 = vector.extract_strided_slice %198 {offsets = [0, 96], sizes = [2, 32], strides = [1, 1]} : vector<2x128xf32> to vector<2x32xf32>
    %204 = arith.mulf %201, %187 : vector<2x32xf32>
    %205 = arith.mulf %200, %202 : vector<2x32xf32>
    %206 = arith.addf %204, %205 : vector<2x32xf32>
    %207 = math.tanh %206 : vector<2x32xf32>
    %208 = arith.mulf %203, %207 : vector<2x32xf32>
    %c5_i32 = arith.constant 5 : i32
    %209 = vector.broadcast %c5_i32 : i32 to vector<2x1xi32>
    %210 = arith.cmpi sgt, %2, %209 : vector<2x1xi32>
    %211 = vector.shape_cast %210 : vector<2x1xi1> to vector<2x1xi1>
    %212 = vector.broadcast %211 : vector<2x1xi1> to vector<2x32xi1>
    %213 = arith.select %212, %206, %187 : vector<2x32xi1>, vector<2x32xf32>
    %214 = vector.shape_cast %210 : vector<2x1xi1> to vector<2x1xi1>
    %215 = vector.broadcast %214 : vector<2x1xi1> to vector<2x32xi1>
    %216 = arith.select %215, %208, %190 : vector<2x32xi1>, vector<2x32xf32>
    %217 = arith.truncf %216 : vector<2x32xf32> to vector<2x32xbf16>
    %cst_57 = arith.constant dense<0.000000e+00> : vector<2x128xf32>
    %218 = tpu.matmul %217, %1, %cst_57 {dimension_numbers = #tpu.dot_dimension_numbers<[1], [0], [0], [1], [0, 0, 1, 1], [], []>} : vector<2x32xbf16>, vector<32x128xbf16>, vector<2x128xf32> -> vector<2x128xf32>
    %219 = arith.addf %51, %218 : vector<2x128xf32>
    %220 = arith.negf %219 : vector<2x128xf32>
    %221 = math.exp %220 : vector<2x128xf32>
    %cst_58 = arith.constant 1.000000e+00 : f32
    %222 = vector.broadcast %cst_58 : f32 to vector<2x128xf32>
    %223 = arith.addf %222, %221 : vector<2x128xf32>
    %224 = arith.divf %222, %223 : vector<2x128xf32>
    %225 = math.tanh %219 : vector<2x128xf32>
    %226 = vector.extract_strided_slice %224 {offsets = [0, 0], sizes = [2, 32], strides = [1, 1]} : vector<2x128xf32> to vector<2x32xf32>
    %227 = vector.extract_strided_slice %224 {offsets = [0, 32], sizes = [2, 32], strides = [1, 1]} : vector<2x128xf32> to vector<2x32xf32>
    %228 = vector.extract_strided_slice %225 {offsets = [0, 64], sizes = [2, 32], strides = [1, 1]} : vector<2x128xf32> to vector<2x32xf32>
    %229 = vector.extract_strided_slice %224 {offsets = [0, 96], sizes = [2, 32], strides = [1, 1]} : vector<2x128xf32> to vector<2x32xf32>
    %230 = arith.mulf %227, %213 : vector<2x32xf32>
    %231 = arith.mulf %226, %228 : vector<2x32xf32>
    %232 = arith.addf %230, %231 : vector<2x32xf32>
    %233 = math.tanh %232 : vector<2x32xf32>
    %234 = arith.mulf %229, %233 : vector<2x32xf32>
    %c6_i32 = arith.constant 6 : i32
    %235 = vector.broadcast %c6_i32 : i32 to vector<2x1xi32>
    %236 = arith.cmpi sgt, %2, %235 : vector<2x1xi32>
    %237 = vector.shape_cast %236 : vector<2x1xi1> to vector<2x1xi1>
    %238 = vector.broadcast %237 : vector<2x1xi1> to vector<2x32xi1>
    %239 = arith.select %238, %232, %213 : vector<2x32xi1>, vector<2x32xf32>
    %240 = vector.shape_cast %236 : vector<2x1xi1> to vector<2x1xi1>
    %241 = vector.broadcast %240 : vector<2x1xi1> to vector<2x32xi1>
    %242 = arith.select %241, %234, %216 : vector<2x32xi1>, vector<2x32xf32>
    %243 = arith.truncf %242 : vector<2x32xf32> to vector<2x32xbf16>
    %cst_59 = arith.constant dense<0.000000e+00> : vector<2x128xf32>
    %244 = tpu.matmul %243, %1, %cst_59 {dimension_numbers = #tpu.dot_dimension_numbers<[1], [0], [0], [1], [0, 0, 1, 1], [], []>} : vector<2x32xbf16>, vector<32x128xbf16>, vector<2x128xf32> -> vector<2x128xf32>
    %245 = arith.addf %58, %244 : vector<2x128xf32>
    %246 = arith.negf %245 : vector<2x128xf32>
    %247 = math.exp %246 : vector<2x128xf32>
    %cst_60 = arith.constant 1.000000e+00 : f32
    %248 = vector.broadcast %cst_60 : f32 to vector<2x128xf32>
    %249 = arith.addf %248, %247 : vector<2x128xf32>
    %250 = arith.divf %248, %249 : vector<2x128xf32>
    %251 = math.tanh %245 : vector<2x128xf32>
    %252 = vector.extract_strided_slice %250 {offsets = [0, 0], sizes = [2, 32], strides = [1, 1]} : vector<2x128xf32> to vector<2x32xf32>
    %253 = vector.extract_strided_slice %250 {offsets = [0, 32], sizes = [2, 32], strides = [1, 1]} : vector<2x128xf32> to vector<2x32xf32>
    %254 = vector.extract_strided_slice %251 {offsets = [0, 64], sizes = [2, 32], strides = [1, 1]} : vector<2x128xf32> to vector<2x32xf32>
    %255 = vector.extract_strided_slice %250 {offsets = [0, 96], sizes = [2, 32], strides = [1, 1]} : vector<2x128xf32> to vector<2x32xf32>
    %256 = arith.mulf %253, %239 : vector<2x32xf32>
    %257 = arith.mulf %252, %254 : vector<2x32xf32>
    %258 = arith.addf %256, %257 : vector<2x32xf32>
    %259 = math.tanh %258 : vector<2x32xf32>
    %260 = arith.mulf %255, %259 : vector<2x32xf32>
    %c7_i32 = arith.constant 7 : i32
    %261 = vector.broadcast %c7_i32 : i32 to vector<2x1xi32>
    %262 = arith.cmpi sgt, %2, %261 : vector<2x1xi32>
    %263 = vector.shape_cast %262 : vector<2x1xi1> to vector<2x1xi1>
    %264 = vector.broadcast %263 : vector<2x1xi1> to vector<2x32xi1>
    %265 = arith.select %264, %260, %242 : vector<2x32xi1>, vector<2x32xf32>
    %c32 = arith.constant 32 : index
    %c0_61 = arith.constant 0 : index
    %266 = vector.load %arg3[%c32, %c0_61] : memref<152x128xf32, #tpu.memory_space<vmem>>, vector<32x32xf32>
    %267 = arith.truncf %266 : vector<32x32xf32> to vector<32x32xbf16>
    %c64 = arith.constant 64 : index
    %c0_62 = arith.constant 0 : index
    %268 = vector.load %arg3[%c64, %c0_62] : memref<152x128xf32, #tpu.memory_space<vmem>>, vector<1x32xf32>
    %c72 = arith.constant 72 : index
    %c0_63 = arith.constant 0 : index
    %269 = vector.load %arg3[%c72, %c0_63] : memref<152x128xf32, #tpu.memory_space<vmem>>, vector<32x32xf32>
    %270 = arith.truncf %269 : vector<32x32xf32> to vector<32x32xbf16>
    %c104 = arith.constant 104 : index
    %c0_64 = arith.constant 0 : index
    %271 = vector.load %arg3[%c104, %c0_64] : memref<152x128xf32, #tpu.memory_space<vmem>>, vector<1x32xf32>
    %c112 = arith.constant 112 : index
    %c0_65 = arith.constant 0 : index
    %272 = vector.load %arg3[%c112, %c0_65] : memref<152x128xf32, #tpu.memory_space<vmem>>, vector<32x128xf32>
    %273 = arith.truncf %272 : vector<32x128xf32> to vector<32x128xbf16>
    %c144 = arith.constant 144 : index
    %c0_66 = arith.constant 0 : index
    %274 = vector.load %arg3[%c144, %c0_66] : memref<152x128xf32, #tpu.memory_space<vmem>>, vector<1x128xf32>
    %275 = arith.truncf %265 : vector<2x32xf32> to vector<2x32xbf16>
    %cst_67 = arith.constant dense<0.000000e+00> : vector<2x32xf32>
    %276 = tpu.matmul %275, %267, %cst_67 {dimension_numbers = #tpu.dot_dimension_numbers<[1], [0], [0], [1], [0, 0, 1, 1], [], []>} : vector<2x32xbf16>, vector<32x32xbf16>, vector<2x32xf32> -> vector<2x32xf32>
    %277 = vector.broadcast %268 : vector<1x32xf32> to vector<2x32xf32>
    %278 = arith.addf %276, %277 : vector<2x32xf32>
    %cst_68 = arith.constant 0.000000e+00 : f32
    %279 = vector.broadcast %cst_68 : f32 to vector<2x32xf32>
    %280 = arith.maximumf %278, %279 : vector<2x32xf32>
    %281 = arith.truncf %280 : vector<2x32xf32> to vector<2x32xbf16>
    %cst_69 = arith.constant dense<0.000000e+00> : vector<2x32xf32>
    %282 = tpu.matmul %281, %270, %cst_69 {dimension_numbers = #tpu.dot_dimension_numbers<[1], [0], [0], [1], [0, 0, 1, 1], [], []>} : vector<2x32xbf16>, vector<32x32xbf16>, vector<2x32xf32> -> vector<2x32xf32>
    %283 = vector.broadcast %271 : vector<1x32xf32> to vector<2x32xf32>
    %284 = arith.addf %282, %283 : vector<2x32xf32>
    %cst_70 = arith.constant 0.000000e+00 : f32
    %285 = vector.broadcast %cst_70 : f32 to vector<2x32xf32>
    %286 = arith.maximumf %284, %285 : vector<2x32xf32>
    %287 = arith.truncf %286 : vector<2x32xf32> to vector<2x32xbf16>
    %cst_71 = arith.constant dense<0.000000e+00> : vector<2x128xf32>
    %288 = tpu.matmul %287, %273, %cst_71 {dimension_numbers = #tpu.dot_dimension_numbers<[1], [0], [0], [1], [0, 0, 1, 1], [], []>} : vector<2x32xbf16>, vector<32x128xbf16>, vector<2x128xf32> -> vector<2x128xf32>
    %289 = vector.broadcast %274 : vector<1x128xf32> to vector<2x128xf32>
    %290 = arith.addf %288, %289 : vector<2x128xf32>
    %cst_72 = arith.constant dense<0xFF800000> : vector<2xf32>
    %291 = vector.multi_reduction <maximumf>, %290, %cst_72 [1] : vector<2x128xf32> to vector<2xf32>
    %292 = vector.shape_cast %291 : vector<2xf32> to vector<2x1xf32>
    %293 = vector.broadcast %292 : vector<2x1xf32> to vector<2x128xf32>
    %294 = arith.subf %290, %293 : vector<2x128xf32>
    %295 = math.exp %294 : vector<2x128xf32>
    %cst_73 = arith.constant dense<0.000000e+00> : vector<2xf32>
    %296 = vector.multi_reduction <add>, %295, %cst_73 [1] : vector<2x128xf32> to vector<2xf32>
    %297 = vector.shape_cast %296 : vector<2xf32> to vector<2x1xf32>
    %298 = math.log %297 : vector<2x1xf32>
    %299 = vector.broadcast %298 : vector<2x1xf32> to vector<2x128xf32>
    %300 = arith.subf %294, %299 : vector<2x128xf32>
    %c0_74 = arith.constant 0 : index
    %c0_75 = arith.constant 0 : index
    %301 = vector.load %arg4[%c0_74, %c0_75] : memref<2x128xf32, #tpu.memory_space<vmem>>, vector<2x128xf32>
    tpu.vector_store %arg4[%c0_74, %c0_75], %300 {strides = array<i32>} : memref<2x128xf32, #tpu.memory_space<vmem>>, vector<2x128xf32>,
    return
  }
}

</mosaic_0001>

<bundles_post_ra>
// kernel: forward.1
= control target key start
LH: loop header
LB: loop body
LE: loop exit
PB: predicated region body
PF: predicated region fallthrough
CT: control target
= control target key end

     0   :  { %9 = vsyncpa [#allocation5], 0  ;;  %s1547_s0 = inlined_call_operand.vmem [shape: s32[8,2], index: 0, kind: input, shape index: {}]   ;;  %s1548_s1 = inlined_call_operand.vmem [shape: f32[20,128], index: 1, kind: input, shape index: {}]   ;;  %s1549_s2 = inlined_call_operand.vmem [shape: s32[2,1], index: 2, kind: input, shape index: {}]   ;;  %s1550_s3 = inlined_call_operand.hbm [shape: f32[152,128], index: 3, kind: input, shape index: {}]   ;;  %s1551_s4 = inlined_call_operand.hbm [shape: f32[2,128], index: 4, kind: output, shape index: {}]  }
   0x1   :  { %10 = vsyncpa [#allocation3], 0 }
   0x2   :  { %11 = vsyncpa [#allocation4], 0  ;;  %s18_s17 = sshll.u32 %s1547_s0, 4  ;;  %s19_s17 = int_to_ptr.vmem [resolvable:$true] %s18_s17 }
   0x3   :  { %s1223_s18 = scalar_lea.vmem %s19_s17, 128  ;;  %p1228_p1 = scmp.lt.s32.totalorder %s19_s17, %s19_s17 }
   0x4   :  { %p1224_p0 = scmp.ne.s32.totalorder %s19_s17, %s1223_s18  ;;  %p1229_p2 = scmp.lt.s32.totalorder %s1223_s18, %s1223_s18 }
   0x6   :  { %p1230_p3 = por %p1229_p2, %p1228_p1 }
   0x8   :  { %p1231_p4 = pnand %p1230_p3, %p1224_p0 }
   0xa   :  { %1234 = shalt.err (!%p1231_p4)
}
   0xb   :  { %s1285_s19 = smov [#allocation2]   ;;  %s1286_s20 = smov [#allocation6]  }
   0xc   :  { %21 = dma.vmem_to_smem %s19_s17, 128, %s1285_s19, [#allocation5]  }
   0xd   :  { %s31_s21 = sshll.u32 %s1286_s20, 4  ;;  %s1235_s24 = scalar_lea.hbm %s1550_s3, 2432  ;;  %s32_s21 = int_to_ptr.vmem [resolvable:$true] %s31_s21 }
   0xe   :  { %p1236_p5 = scmp.ne.s32.totalorder %s1550_s3, %s1235_s24  ;;  %p1239_p6 = scmp.lt.u32.totalorder %s1235_s24, %s1550_s3 }
  0x10   :  { %p1241_p7 = pnand %p1239_p6, %p1236_p5 }
  0x12   :  { %1244 = shalt.err (!%p1241_p7)
}
  0x13   :  { %s1245_s28 = scalar_lea.vmem %s32_s21, 2432  ;;  %p1250_p9 = scmp.lt.s32.totalorder %s32_s21, %s32_s21 }
  0x14   :  { %p1246_p8 = scmp.ne.s32.totalorder %s32_s21, %s1245_s28  ;;  %p1251_p10 = scmp.lt.s32.totalorder %s1245_s28, %s1245_s28 }
  0x16   :  { %p1252_p11 = por %p1251_p10, %p1250_p9 }
  0x18   :  { %p1253_p12 = pnand %p1252_p11, %p1246_p8 }
  0x1a   :  { %1256 = shalt.err (!%p1253_p12)
}
  0x1b   :  { %s1287_s29 = smov 128   ;;  %s1288_s30 = smov 8  }
  0x1c   :  { %37 = dma.hbm_to_vmem [thread:$0]  %s1550_s3, 2432, %s32_s21, [#allocation3], %s1287_s29, %s1287_s29, %s1288_s30  }
  0x1d   :  { %1279 = dma.done.wait [#allocation5], 128  }
  0x1e   :  { %1280 = vsyncadd [#allocation5], 4294967168 }
  0x1f   :  { %1281 = dma.done.wait [#allocation3], 2432  }
  0x20   :  { %1282 = vsyncadd [#allocation3], 4294964864 }
  0x21   :  { %44 = sfence }
  0x22   :  { %v46_v0 = vld [vmem:[#allocation6] sm:$0xff]  ;;  %v47_v1 = vld [vmem:[#allocation6 + $0x8] sm:$0xff]  ;;  %v48_v2 = vld [vmem:[#allocation6 + $0x10] sm:$0xff]  ;;  %v1289_v3 = vmov 0.0   ;;  %vm1290_vm0 = vmmov 0   ;;  %v1291_v6 = vmov 0  }
  0x23   :  { %1055 = vmatprep.subr.bf16.mxu0 %v1289_v3  ;;  %v1336_v4 = vpack.c.bf16 %v47_v1, %v46_v0  ;;  %v49_v5 = vld [vmem:[#allocation6 + $0x18] sm:$0xff]  ;;  %1059 = vmatprep.mubr.msk.bf16.mxu0 %vm1290_vm0, %v1289_v3  ;;  %v1365_v8 = vld [vmem:[%s1549_s2] sm:$0x3]  ;;  %s986_s8 = sld [smem:[#allocation2 + $0x1]]  ;;  %s53_s9 = sld [smem:[#allocation2]]  ;;  %vm62_vm2 = vcmask 1040384  }
  0x24   :  { %1153 = vset.pattern.permute.xlu1 %v1291_v6  ;;  %1063 = vmatprep.subr.bf16.mxu1 %v1289_v3  ;;  %v1343_v7 = vpack.c.bf16 %v49_v5, %v48_v2  ;;  %vm203_vm1 = vcmp.gt.s32.totalorder %v1365_v8, 0  ;;  %s1292_s2 = smov 64   ;;  %s1293_s16 = smov 32   ;;  %vm134_vm4 = vcmask 261120   ;;  %vm283_vm5 = vcmp.gt.s32.totalorder %v1365_v8, 1 }
  0x25   :  { %1056 = vmatpush3.bf16.msra.mxu0 %v1336_v4  ;;  %1064 = vmatpush3.bf16.msra.mxu1 %v1336_v4  ;;  %v204_v9 = vsel %vm203_vm1, 1, %v1291_v6  ;;  %s988_s17 = sld [smem:[#allocation2 + $0x81]]  ;;  %s987_s18 = sld [smem:[#allocation2 + $0x80]]  ;;  %v284_v46 = vsel %vm283_vm5, 1, %v1291_v6  ;;  %vm363_vm7 = vcmp.gt.s32.totalorder %v1365_v8, 2  ;;  %vm443_vm9 = vcmp.gt.s32.totalorder %v1365_v8, 3 }
  0x26   :  { %1057 = vmatprep.subr.bf16.mxu0 %v1289_v3  ;;  %1065 = vmatprep.subr.bf16.mxu1 %v1289_v3  ;;  %s990_s25 = sld [smem:[#allocation2 + $0x101]]  ;;  %s989_s26 = sld [smem:[#allocation2 + $0x100]]  ;;  %vm523_vm11 = vcmp.gt.s32.totalorder %v1365_v8, 4  ;;  %vm603_vm13 = vcmp.gt.s32.totalorder %v1365_v8, 5  ;;  %vm683_vm15 = vcmp.gt.s32.totalorder %v1365_v8, 6 }
  0x27   :  { %1067 = vmatprep.mubr.msk.bf16.mxu1 %vm1290_vm0, %v1289_v3  ;;  %1154 = vset.pattern.permute.xlu0 %v1291_v6  ;;  %s992_s6 = sld [smem:[#allocation2 + $0x181]]  ;;  %s991_s3 = sld [smem:[#allocation2 + $0x180]] }
  0x28   :  { %206 = vperm.xlu1 %1153, %v204_v9   ;;  %s994_s13 = sld [smem:[#allocation2 + $0x201]]  ;;  %s993_s14 = sld [smem:[#allocation2 + $0x200]] }
  0x29   :  { %1058 = vmatpush3.bf16.msra.mxu0 %v1343_v7  ;;  %1066 = vmatpush3.bf16.msra.mxu1 %v1343_v7  ;;  %s57_s12 = scalar_lea.vmem %s1548_s1, %s986_s8  ;;  %s54_s15 = scalar_lea.vmem %s1548_s1, %s53_s9 }
  0x2a   :  { %1071 = vmatprep.subr.bf16.mxu0 %v1289_v3  ;;  %1079 = vmatprep.subr.bf16.mxu1 %v1289_v3  ;;  %v58_v10 = vld [vmem:[%s57_s12] sm:$0x1]  ;;  %s996_s22 = sld [smem:[#allocation2 + $0x281]]  ;;  %s995_s23 = sld [smem:[#allocation2 + $0x280]] }
  0x2b   :  { %v60_v11 = vrot.slane %v58_v10, 7  ;;  %v55_v12 = vld [vmem:[%s54_s15] sm:$0x1]  ;;  %s68_s21 = scalar_lea.vmem %s1548_s1, %s988_s17  ;;  %s65_s24 = scalar_lea.vmem %s1548_s1, %s987_s18 }
  0x2c   :  { %1060 = vmatmul.mubr.bf16.vlgmr.msra.gmra.mrb[0].mxu0 %v1291_v6  ;;  %v69_v36 = vld [vmem:[%s68_s21] sm:$0x1]  ;;  %s78_s28 = scalar_lea.vmem %s1548_s1, %s990_s25  ;;  %s75_s5 = scalar_lea.vmem %s1548_s1, %s989_s26 }
  0x2d   :  { %1072 = vmatpush3.bf16.msra.mxu0 %v1336_v4  ;;  %1075 = vmatprep.mubr.msk.bf16.mxu0 %vm1290_vm0, %v1289_v3  ;;  %v63_v13 = vsel %vm62_vm2, %v55_v12, %v60_v11  ;;  %v71_v37 = vrot.slane %v69_v36, 7  ;;  %v66_v38 = vld [vmem:[%s65_s24] sm:$0x1]  ;;  %s88_s9 = scalar_lea.vmem %s1548_s1, %s992_s6  ;;  %s85_s12 = scalar_lea.vmem %s1548_s1, %s991_s3 }
  0x2e   :  { %1073 = vmatprep.subr.bf16.mxu0 %v1289_v3  ;;  %v79_v0 = vld [vmem:[%s78_s28] sm:$0x1]  ;;  %s98_s18 = scalar_lea.vmem %s1548_s1, %s994_s13  ;;  %s95_s21 = scalar_lea.vmem %s1548_s1, %s993_s14 }
  0x2f   :  { %v73_v39 = vsel %vm62_vm2, %v66_v38, %v71_v37  ;;  %v81_v1 = vrot.slane %v79_v0, 7  ;;  %v76_v2 = vld [vmem:[%s75_s5] sm:$0x1]  ;;  %s998_s29 = sld [smem:[#allocation2 + $0x301]]  ;;  %s997_s30 = sld [smem:[#allocation2 + $0x300]] }
  0x30   :  { %s108_s26 = scalar_lea.vmem %s1548_s1, %s996_s22  ;;  %s105_s28 = scalar_lea.vmem %s1548_s1, %s995_s23 }
  0x31   :  { %1074 = vmatpush3.bf16.msra.mxu0 %v1343_v7  ;;  %v83_v5 = vsel %vm62_vm2, %v76_v2, %v81_v1  ;;  %s1000_s10 = sld [smem:[#allocation2 + $0x381]]  ;;  %s999_s11 = sld [smem:[#allocation2 + $0x380]] }
  0x32   :  { %1087 = vmatprep.subr.bf16.mxu0 %v1289_v3 }
  0x35   :  { %s118_s3 = scalar_lea.vmem %s1548_s1, %s998_s29 }
  0x37   :  { %s128_s14 = scalar_lea.vmem %s1548_s1, %s1000_s10 }
  0xa7   :  { %v207_v30 = vpop.permute.xlu1 %206 }
  0xa8   :  { %vm208_vm3 = vcmp.eq.s32.totalorder %v207_v30, 1 }
  0xff   :  { %v172_v14 = vpop.f32.mrb[0].mxu0 }
 0x100   :  { %v178_v15 = vadd.f32 %v172_v14, %v63_v13  ;;  %v1061_v16 = vpop.f32.mrb[1].mxu0 }
 0x101   :  { %v175_v17 = vpop.f32.mrb[2].mxu0 }
 0x102   :  { %1155 = vtanh.f32 %v178_v15  ;;  %v1062_v18 = vpop.f32.mrb[3].mxu0  ;;  %v1001_v20 = vmul.f32 -1.442695, %v178_v15  ;;  %v364_v15 = vsel %vm363_vm7, 1, %v1291_v6 }
 0x104   :  { %1157 = vpow2.f32 %v1001_v20 }
 0x10c   :  { %v1156_v19 = vpop.eup %1155 }
 0x10d   :  { %188 = vrot.lane.b32.xlu0 %v1156_v19, %s1292_s2 }
 0x10e   :  { %v1158_v21 = vpop.eup %1157 }
 0x10f   :  { %v182_v22 = vadd.f32 1.0, %v1158_v21 }
 0x111   :  { %1159 = vrcp.f32 %v182_v22 }
 0x11b   :  { %v1160_v23 = vpop.eup %1159 }
 0x11c   :  { %v186_v26 = vmul.f32 0.0, %v1160_v23 }
 0x17f   :  { %v189_v24 = vpop.permute.xlu0 %188 }
 0x180   :  { %v191_v25 = vmul.f32 %v1160_v23, %v189_v24 }
 0x182   :  { %193 = vrot.lane.b32.xlu0 %v191_v25, %s1293_s16 }
 0x1f4   :  { %v194_v27 = vpop.permute.xlu0 %193 }
 0x1f5   :  { %v196_v28 = vadd.f32 %v194_v27, %v186_v26 }
 0x1f7   :  { %1161 = vtanh.f32 %v196_v28  ;;  %v209_v53 = vsel %vm208_vm3, %v196_v28, 0.0 }
 0x201   :  { %v1162_v29 = vpop.eup %1161 }
 0x202   :  { %199 = vrot.lane.b32.xlu1 %v1162_v29, %s1292_s2 }
 0x274   :  { %v200_v31 = vpop.permute.xlu1 %199 }
 0x275   :  { %v202_v32 = vmul.f32 %v1160_v23, %v200_v31 }
 0x277   :  { %v210_v33 = vsel %vm208_vm3, %v202_v32, 0.0  ;;  %vm763_vm3 = vcmp.gt.s32.totalorder %v1365_v8, 7 }
 0x278   :  { %v211_v34 = vpack.c.bf16 %v210_v33, %v210_v33 }
 0x27a   :  { %213 = vrot.lane.b32.xlu0 %v211_v34, %s1293_s16 }
 0x2ec   :  { %v214_v35 = vpop.permute.xlu0 %213 }
 0x2ed   :  { %1068 = vmatmul.mubr.msk.bf16.vlgmr.msra.gmra.mrb[0].mxu1 %vm134_vm4, %v214_v35  ;;  %v86_v35 = vld [vmem:[%s85_s12] sm:$0x1] }
 0x2ee   :  { %1080 = vmatpush3.bf16.msra.mxu1 %v1336_v4  ;;  %1083 = vmatprep.mubr.msk.bf16.mxu1 %vm1290_vm0, %v1289_v3 }
 0x2ef   :  { %1081 = vmatprep.subr.bf16.mxu1 %v1289_v3 }
 0x2f2   :  { %1082 = vmatpush3.bf16.msra.mxu1 %v1343_v7 }
 0x2f3   :  { %1095 = vmatprep.subr.bf16.mxu1 %v1289_v3 }
 0x3c0   :  { %v252_v40 = vpop.f32.mrb[0].mxu1 }
 0x3c1   :  { %v258_v41 = vadd.f32 %v252_v40, %v73_v39  ;;  %v1069_v42 = vpop.f32.mrb[1].mxu1 }
 0x3c2   :  { %v255_v43 = vpop.f32.mrb[2].mxu1 }
 0x3c3   :  { %1163 = vtanh.f32 %v258_v41  ;;  %v1070_v44 = vpop.f32.mrb[3].mxu1  ;;  %v1003_v47 = vmul.f32 -1.442695, %v258_v41  ;;  %v444_v43 = vsel %vm443_vm9, 1, %v1291_v6 }
 0x3c5   :  { %1165 = vpow2.f32 %v1003_v47 }
 0x3cd   :  { %v1164_v45 = vpop.eup %1163 }
 0x3ce   :  { %268 = vrot.lane.b32.xlu1 %v1164_v45, %s1292_s2 }
 0x3cf   :  { %v1166_v48 = vpop.eup %1165 }
 0x3d0   :  { %v262_v49 = vadd.f32 1.0, %v1166_v48 }
 0x3d2   :  { %286 = vperm.xlu1 %1153, %v284_v46   ;;  %1167 = vrcp.f32 %v262_v49 }
 0x3dc   :  { %v1168_v50 = vpop.eup %1167 }
 0x3dd   :  { %v266_v54 = vmul.f32 %v1168_v50, %v209_v53 }
 0x440   :  { %v269_v51 = vpop.permute.xlu1 %268 }
 0x441   :  { %v271_v52 = vmul.f32 %v1168_v50, %v269_v51 }
 0x443   :  { %273 = vrot.lane.b32.xlu0 %v271_v52, %s1293_s16 }
 0x451   :  { %v287_v58 = vpop.permute.xlu1 %286 }
 0x452   :  { %vm288_vm6 = vcmp.eq.s32.totalorder %v287_v58, 1 }
 0x4b5   :  { %v274_v55 = vpop.permute.xlu0 %273 }
 0x4b6   :  { %v276_v56 = vadd.f32 %v274_v55, %v266_v54 }
 0x4b8   :  { %1169 = vtanh.f32 %v276_v56  ;;  %v289_v22 = vsel %vm288_vm6, %v276_v56, %v209_v53 }
 0x4c2   :  { %v1170_v57 = vpop.eup %1169 }
 0x4c3   :  { %279 = vrot.lane.b32.xlu0 %v1170_v57, %s1292_s2 }
 0x535   :  { %v280_v59 = vpop.permute.xlu0 %279 }
 0x536   :  { %v282_v60 = vmul.f32 %v1168_v50, %v280_v59 }
 0x538   :  { %v290_v61 = vsel %vm288_vm6, %v282_v60, %v210_v33  ;;  %v89_v33 = vld [vmem:[%s88_s9] sm:$0x1]  ;;  %s115_s9 = scalar_lea.vmem %s1548_s1, %s997_s30 }
 0x539   :  { %v291_v62 = vpack.c.bf16 %v290_v61, %v290_v61  ;;  %v91_v34 = vrot.slane %v89_v33, 7 }
 0x53b   :  { %293 = vrot.lane.b32.xlu1 %v291_v62, %s1293_s16  ;;  %v93_v36 = vsel %vm62_vm2, %v86_v35, %v91_v34 }
 0x5ad   :  { %v294_v63 = vpop.permute.xlu1 %293 }
 0x5ae   :  { %1076 = vmatmul.mubr.msk.bf16.vlgmr.msra.gmra.mrb[4].mxu0 %vm134_vm4, %v294_v63  ;;  %v96_v63 = vld [vmem:[%s95_s21] sm:$0x1] }
 0x5af   :  { %1088 = vmatpush3.bf16.msra.mxu0 %v1336_v4  ;;  %1091 = vmatprep.mubr.msk.bf16.mxu0 %vm1290_vm0, %v1289_v3 }
 0x5b0   :  { %1089 = vmatprep.subr.bf16.mxu0 %v1289_v3 }
 0x5b3   :  { %1090 = vmatpush3.bf16.msra.mxu0 %v1343_v7 }
 0x5b4   :  { %1103 = vmatprep.subr.bf16.mxu0 %v1289_v3 }
 0x681   :  { %v332_v9 = vpop.f32.mrb[4].mxu0 }
 0x682   :  { %v338_v10 = vadd.f32 %v332_v9, %v83_v5  ;;  %v1077_v11 = vpop.f32.mrb[5].mxu0 }
 0x683   :  { %v335_v12 = vpop.f32.mrb[6].mxu0 }
 0x684   :  { %1171 = vtanh.f32 %v338_v10  ;;  %v1078_v13 = vpop.f32.mrb[7].mxu0  ;;  %v1005_v16 = vmul.f32 -1.442695, %v338_v10  ;;  %v524_v12 = vsel %vm523_vm11, 1, %v1291_v6 }
 0x686   :  { %1173 = vpow2.f32 %v1005_v16 }
 0x68e   :  { %v1172_v14 = vpop.eup %1171 }
 0x68f   :  { %348 = vrot.lane.b32.xlu0 %v1172_v14, %s1292_s2 }
 0x690   :  { %v1174_v17 = vpop.eup %1173 }
 0x691   :  { %v342_v18 = vadd.f32 1.0, %v1174_v17 }
 0x693   :  { %366 = vperm.xlu0 %1154, %v364_v15   ;;  %1175 = vrcp.f32 %v342_v18 }
 0x69d   :  { %v1176_v19 = vpop.eup %1175 }
 0x69e   :  { %v346_v23 = vmul.f32 %v1176_v19, %v289_v22 }
 0x701   :  { %v349_v20 = vpop.permute.xlu0 %348 }
 0x702   :  { %v351_v21 = vmul.f32 %v1176_v19, %v349_v20 }
 0x704   :  { %353 = vrot.lane.b32.xlu1 %v351_v21, %s1293_s16 }
 0x712   :  { %v367_v27 = vpop.permute.xlu0 %366 }
 0x713   :  { %vm368_vm8 = vcmp.eq.s32.totalorder %v367_v27, 1 }
 0x776   :  { %v354_v24 = vpop.permute.xlu1 %353 }
 0x777   :  { %v356_v25 = vadd.f32 %v354_v24, %v346_v23 }
 0x779   :  { %1177 = vtanh.f32 %v356_v25  ;;  %v369_v50 = vsel %vm368_vm8, %v356_v25, %v289_v22 }
 0x783   :  { %v1178_v26 = vpop.eup %1177 }
 0x784   :  { %359 = vrot.lane.b32.xlu1 %v1178_v26, %s1292_s2 }
 0x7f6   :  { %v360_v28 = vpop.permute.xlu1 %359 }
 0x7f7   :  { %v362_v29 = vmul.f32 %v1176_v19, %v360_v28 }
 0x7f9   :  { %v370_v30 = vsel %vm368_vm8, %v362_v29, %v290_v61  ;;  %v99_v61 = vld [vmem:[%s98_s18] sm:$0x1]  ;;  %s125_s18 = scalar_lea.vmem %s1548_s1, %s999_s11  ;;  %s1294_s1 = smov [#allocation7]  }
 0x7fa   :  { %v371_v31 = vpack.c.bf16 %v370_v30, %v370_v30  ;;  %v101_v62 = vrot.slane %v99_v61, 7 }
 0x7fc   :  { %373 = vrot.lane.b32.xlu1 %v371_v31, %s1293_s16  ;;  %v103_v0 = vsel %vm62_vm2, %v96_v63, %v101_v62  ;;  %v106_v31 = vld [vmem:[%s105_s28] sm:$0x1] }
 0x86e   :  { %v374_v32 = vpop.permute.xlu1 %373 }
 0x86f   :  { %1084 = vmatmul.mubr.msk.bf16.vlgmr.msra.gmra.mrb[4].mxu1 %vm134_vm4, %v374_v32 }
 0x870   :  { %1096 = vmatpush3.bf16.msra.mxu1 %v1336_v4  ;;  %1099 = vmatprep.mubr.msk.bf16.mxu1 %vm1290_vm0, %v1289_v3 }
 0x871   :  { %1097 = vmatprep.subr.bf16.mxu1 %v1289_v3 }
 0x874   :  { %1098 = vmatpush3.bf16.msra.mxu1 %v1343_v7 }
 0x875   :  { %1111 = vmatprep.subr.bf16.mxu1 %v1289_v3 }
 0x942   :  { %v412_v37 = vpop.f32.mrb[4].mxu1 }
 0x943   :  { %v418_v38 = vadd.f32 %v412_v37, %v93_v36  ;;  %v1085_v39 = vpop.f32.mrb[5].mxu1 }
 0x944   :  { %v415_v40 = vpop.f32.mrb[6].mxu1 }
 0x945   :  { %1179 = vtanh.f32 %v418_v38  ;;  %v1086_v41 = vpop.f32.mrb[7].mxu1  ;;  %v1007_v44 = vmul.f32 -1.442695, %v418_v38  ;;  %v604_v38 = vsel %vm603_vm13, 1, %v1291_v6 }
 0x947   :  { %1181 = vpow2.f32 %v1007_v44 }
 0x94f   :  { %v1180_v42 = vpop.eup %1179 }
 0x950   :  { %428 = vrot.lane.b32.xlu0 %v1180_v42, %s1292_s2 }
 0x951   :  { %v1182_v45 = vpop.eup %1181 }
 0x952   :  { %v422_v46 = vadd.f32 1.0, %v1182_v45 }
 0x954   :  { %446 = vperm.xlu0 %1154, %v444_v43   ;;  %1183 = vrcp.f32 %v422_v46 }
 0x95e   :  { %v1184_v47 = vpop.eup %1183 }
 0x95f   :  { %v426_v51 = vmul.f32 %v1184_v47, %v369_v50 }
 0x9c2   :  { %v429_v48 = vpop.permute.xlu0 %428 }
 0x9c3   :  { %v431_v49 = vmul.f32 %v1184_v47, %v429_v48 }
 0x9c5   :  { %433 = vrot.lane.b32.xlu1 %v431_v49, %s1293_s16 }
 0x9d3   :  { %v447_v55 = vpop.permute.xlu0 %446 }
 0x9d4   :  { %vm448_vm10 = vcmp.eq.s32.totalorder %v447_v55, 1 }
 0xa37   :  { %v434_v52 = vpop.permute.xlu1 %433 }
 0xa38   :  { %v436_v53 = vadd.f32 %v434_v52, %v426_v51 }
 0xa3a   :  { %1185 = vtanh.f32 %v436_v53  ;;  %v449_v19 = vsel %vm448_vm10, %v436_v53, %v369_v50 }
 0xa44   :  { %v1186_v54 = vpop.eup %1185 }
 0xa45   :  { %439 = vrot.lane.b32.xlu1 %v1186_v54, %s1292_s2 }
 0xab7   :  { %v440_v56 = vpop.permute.xlu1 %439 }
 0xab8   :  { %v442_v57 = vmul.f32 %v1184_v47, %v440_v56  ;;  %v119_v56 = vld [vmem:[%s118_s3] sm:$0x1] }
 0xaba   :  { %v450_v58 = vsel %vm448_vm10, %v442_v57, %v370_v30  ;;  %v109_v30 = vld [vmem:[%s108_s26] sm:$0x1]  ;;  %v121_v57 = vrot.slane %v119_v56, 7 }
 0xabb   :  { %v451_v59 = vpack.c.bf16 %v450_v58, %v450_v58 }
 0xabd   :  { %453 = vrot.lane.b32.xlu0 %v451_v59, %s1293_s16 }
 0xb2f   :  { %v454_v60 = vpop.permute.xlu0 %453 }
 0xb30   :  { %1092 = vmatmul.mubr.msk.bf16.vlgmr.msra.gmra.mrb[8].mxu0 %vm134_vm4, %v454_v60 }
 0xb31   :  { %1104 = vmatpush3.bf16.msra.mxu0 %v1336_v4  ;;  %1107 = vmatprep.mubr.msk.bf16.mxu0 %vm1290_vm0, %v1289_v3 }
 0xb32   :  { %1105 = vmatprep.subr.bf16.mxu0 %v1289_v3 }
 0xb35   :  { %1106 = vmatpush3.bf16.msra.mxu0 %v1343_v7 }
 0xb36   :  { %1119 = vmatprep.subr.bf16.mxu0 %v1289_v3 }
 0xc03   :  { %v492_v1 = vpop.f32.mrb[8].mxu0 }
 0xc04   :  { %v498_v2 = vadd.f32 %v492_v1, %v103_v0  ;;  %v1093_v5 = vpop.f32.mrb[9].mxu0 }
 0xc05   :  { %v495_v9 = vpop.f32.mrb[10].mxu0 }
 0xc06   :  { %1187 = vtanh.f32 %v498_v2  ;;  %v1094_v10 = vpop.f32.mrb[11].mxu0  ;;  %v1009_v13 = vmul.f32 -1.442695, %v498_v2  ;;  %v684_v2 = vsel %vm683_vm15, 1, %v1291_v6 }
 0xc08   :  { %1189 = vpow2.f32 %v1009_v13 }
 0xc10   :  { %v1188_v11 = vpop.eup %1187 }
 0xc11   :  { %508 = vrot.lane.b32.xlu1 %v1188_v11, %s1292_s2 }
 0xc12   :  { %v1190_v14 = vpop.eup %1189 }
 0xc13   :  { %v502_v15 = vadd.f32 1.0, %v1190_v14 }
 0xc15   :  { %526 = vperm.xlu1 %1153, %v524_v12   ;;  %1191 = vrcp.f32 %v502_v15 }
 0xc1f   :  { %v1192_v16 = vpop.eup %1191 }
 0xc20   :  { %v506_v20 = vmul.f32 %v1192_v16, %v449_v19 }
 0xc83   :  { %v509_v17 = vpop.permute.xlu1 %508 }
 0xc84   :  { %v511_v18 = vmul.f32 %v1192_v16, %v509_v17 }
 0xc86   :  { %513 = vrot.lane.b32.xlu0 %v511_v18, %s1293_s16 }
 0xc94   :  { %v527_v24 = vpop.permute.xlu1 %526 }
 0xc95   :  { %vm528_vm12 = vcmp.eq.s32.totalorder %v527_v24, 1 }
 0xcf8   :  { %v514_v21 = vpop.permute.xlu0 %513 }
 0xcf9   :  { %v516_v22 = vadd.f32 %v514_v21, %v506_v20 }
 0xcfb   :  { %1193 = vtanh.f32 %v516_v22  ;;  %v529_v45 = vsel %vm528_vm12, %v516_v22, %v449_v19 }
 0xd05   :  { %v1194_v23 = vpop.eup %1193 }
 0xd06   :  { %519 = vrot.lane.b32.xlu0 %v1194_v23, %s1292_s2 }
 0xd78   :  { %v520_v25 = vpop.permute.xlu0 %519 }
 0xd79   :  { %v522_v26 = vmul.f32 %v1192_v16, %v520_v25  ;;  %v129_v25 = vld [vmem:[%s128_s14] sm:$0x1] }
 0xd7b   :  { %v530_v27 = vsel %vm528_vm12, %v522_v26, %v450_v58  ;;  %v116_v58 = vld [vmem:[%s115_s9] sm:$0x1]  ;;  %v131_v26 = vrot.slane %v129_v25, 7 }
 0xd7c   :  { %v531_v28 = vpack.c.bf16 %v530_v27, %v530_v27  ;;  %v123_v59 = vsel %vm62_vm2, %v116_v58, %v121_v57  ;;  %v779_v58 = vld [vmem:[#allocation6 + $0x58] sm:$0xff] }
 0xd7e   :  { %533 = vrot.lane.b32.xlu1 %v531_v28, %s1293_s16 }
 0xdf0   :  { %v534_v29 = vpop.permute.xlu1 %533 }
 0xdf1   :  { %1100 = vmatmul.mubr.msk.bf16.vlgmr.msra.gmra.mrb[8].mxu1 %vm134_vm4, %v534_v29 }
 0xdf2   :  { %1112 = vmatpush3.bf16.msra.mxu1 %v1336_v4  ;;  %1115 = vmatprep.mubr.msk.bf16.mxu1 %vm1290_vm0, %v1289_v3  ;;  %v111_v4 = vrot.slane %v109_v30, 7 }
 0xdf3   :  { %1113 = vmatprep.subr.bf16.mxu1 %v1289_v3 }
 0xdf4   :  { %v113_v32 = vsel %vm62_vm2, %v106_v31, %v111_v4 }
 0xdf6   :  { %1114 = vmatpush3.bf16.msra.mxu1 %v1343_v7 }
 0xdf7   :  { %1127 = vmatprep.subr.bf16.mxu1 %v1289_v3 }
 0xec4   :  { %v572_v33 = vpop.f32.mrb[8].mxu1 }
 0xec5   :  { %v578_v34 = vadd.f32 %v572_v33, %v113_v32  ;;  %v1101_v7 = vpop.f32.mrb[9].mxu1 }
 0xec6   :  { %v575_v35 = vpop.f32.mrb[10].mxu1 }
 0xec7   :  { %1195 = vtanh.f32 %v578_v34  ;;  %v1102_v36 = vpop.f32.mrb[11].mxu1  ;;  %v1011_v39 = vmul.f32 -1.442695, %v578_v34  ;;  %v764_v34 = vsel %vm763_vm3, 1, %v1291_v6  ;;  %v772_v6 = vld [vmem:[#allocation6 + $0x30] sm:$0xff] }
 0xec9   :  { %1197 = vpow2.f32 %v1011_v39 }
 0xed1   :  { %v1196_v37 = vpop.eup %1195 }
 0xed2   :  { %588 = vrot.lane.b32.xlu0 %v1196_v37, %s1292_s2 }
 0xed3   :  { %v1198_v40 = vpop.eup %1197 }
 0xed4   :  { %v582_v41 = vadd.f32 1.0, %v1198_v40 }
 0xed6   :  { %606 = vperm.xlu0 %1154, %v604_v38   ;;  %1199 = vrcp.f32 %v582_v41 }
 0xee0   :  { %v1200_v42 = vpop.eup %1199 }
 0xee1   :  { %v586_v46 = vmul.f32 %v1200_v42, %v529_v45 }
 0xf44   :  { %v589_v43 = vpop.permute.xlu0 %588 }
 0xf45   :  { %v591_v44 = vmul.f32 %v1200_v42, %v589_v43  ;;  %v770_v43 = vld [vmem:[#allocation6 + $0x20] sm:$0xff] }
 0xf47   :  { %593 = vrot.lane.b32.xlu1 %v591_v44, %s1293_s16  ;;  %v771_v44 = vld [vmem:[#allocation6 + $0x28] sm:$0xff] }
 0xf55   :  { %v607_v50 = vpop.permute.xlu0 %606 }
 0xf56   :  { %vm608_vm14 = vcmp.eq.s32.totalorder %v607_v50, 1  ;;  %v778_v50 = vld [vmem:[#allocation6 + $0x50] sm:$0xff] }
 0xfb9   :  { %v594_v47 = vpop.permute.xlu1 %593 }
 0xfba   :  { %v596_v48 = vadd.f32 %v594_v47, %v586_v46  ;;  %v773_v46 = vld [vmem:[#allocation6 + $0x38] sm:$0xff] }
 0xfbb   :  { %v775_v47 = vpack.c.bf16 %v773_v46, %v772_v6 }
 0xfbc   :  { %1201 = vtanh.f32 %v596_v48  ;;  %v609_v14 = vsel %vm608_vm14, %v596_v48, %v529_v45  ;;  %v774_v45 = vpack.c.bf16 %v771_v44, %v770_v43 }
 0xfc6   :  { %v1202_v49 = vpop.eup %1201 }
 0xfc7   :  { %599 = vrot.lane.b32.xlu1 %v1202_v49, %s1292_s2  ;;  %v777_v49 = vld [vmem:[#allocation6 + $0x48] sm:$0xff] }
0x1039   :  { %v600_v51 = vpop.permute.xlu1 %599 }
0x103a   :  { %v602_v52 = vmul.f32 %v1200_v42, %v600_v51  ;;  %v781_v51 = vpack.c.bf16 %v778_v50, %v777_v49 }
0x103c   :  { %v610_v53 = vsel %vm608_vm14, %v602_v52, %v530_v27  ;;  %v126_v27 = vld [vmem:[%s125_s18] sm:$0x1] }
0x103d   :  { %v611_v54 = vpack.c.bf16 %v610_v53, %v610_v53  ;;  %v133_v28 = vsel %vm62_vm2, %v126_v27, %v131_v26 }
0x103f   :  { %613 = vrot.lane.b32.xlu0 %v611_v54, %s1293_s16 }
0x10b1   :  { %v614_v55 = vpop.permute.xlu0 %613 }
0x10b2   :  { %1108 = vmatmul.mubr.msk.bf16.vlgmr.msra.gmra.mrb[12].mxu0 %vm134_vm4, %v614_v55 }
0x10b3   :  { %1123 = vmatprep.mubr.msk.bf16.mxu0 %vm1290_vm0, %v1289_v3  ;;  %1120 = vmatpush3.bf16.msra.mxu0 %v774_v45 }
0x10b4   :  { %1121 = vmatprep.subr.bf16.mxu0 %v1289_v3 }
0x10b7   :  { %1122 = vmatpush3.bf16.msra.mxu0 %v775_v47 }
0x10b8   :  { %1135 = vmatprep.subr.bf16.mxu0 %v1289_v3 }
0x1185   :  { %v652_v60 = vpop.f32.mrb[12].mxu0 }
0x1186   :  { %v658_v61 = vadd.f32 %v652_v60, %v123_v59  ;;  %v1109_v62 = vpop.f32.mrb[13].mxu0  ;;  %v780_v59 = vld [vmem:[#allocation6 + $0x60] sm:$0xff] }
0x1187   :  { %v655_v63 = vpop.f32.mrb[14].mxu0  ;;  %v782_v60 = vpack.c.bf16 %v780_v59, %v779_v58  ;;  %v785_v62 = vld [vmem:[#allocation6 + $0x78] sm:$0xff] }
0x1188   :  { %1203 = vtanh.f32 %v658_v61  ;;  %v1110_v0 = vpop.f32.mrb[15].mxu0  ;;  %v1013_v5 = vmul.f32 -1.442695, %v658_v61  ;;  %v784_v61 = vld [vmem:[#allocation6 + $0x70] sm:$0xff] }
0x1189   :  { %v788_v63 = vpack.c.bf16 %v785_v62, %v784_v61  ;;  %v1016_v0 = vld [vmem:[#allocation6 + $0x40] ss:$0 sm:$0xff] }
0x118a   :  { %1205 = vpow2.f32 %v1013_v5 }
0x1192   :  { %v1204_v1 = vpop.eup %1203 }
0x1193   :  { %668 = vrot.lane.b32.xlu1 %v1204_v1, %s1292_s2 }
0x1194   :  { %v1206_v9 = vpop.eup %1205 }
0x1195   :  { %v662_v10 = vadd.f32 1.0, %v1206_v9 }
0x1197   :  { %686 = vperm.xlu1 %1153, %v684_v2   ;;  %1207 = vrcp.f32 %v662_v10 }
0x11a1   :  { %v1208_v11 = vpop.eup %1207 }
0x11a2   :  { %v666_v15 = vmul.f32 %v1208_v11, %v609_v14 }
0x1205   :  { %v669_v12 = vpop.permute.xlu1 %668 }
0x1206   :  { %v671_v13 = vmul.f32 %v1208_v11, %v669_v12 }
0x1208   :  { %673 = vrot.lane.b32.xlu0 %v671_v13, %s1293_s16  ;;  %v786_v13 = vld [vmem:[#allocation6 + $0x80] sm:$0xff] }
0x1216   :  { %v687_v19 = vpop.permute.xlu1 %686 }
0x1217   :  { %vm688_vm1 = vcmp.eq.s32.totalorder %v687_v19, 1 }
0x127a   :  { %v674_v16 = vpop.permute.xlu0 %673 }
0x127b   :  { %v676_v17 = vadd.f32 %v674_v16, %v666_v15  ;;  %v1018_v16 = vld [vmem:[#allocation6 + $0x68] ss:$0 sm:$0xff] }
0x127d   :  { %1209 = vtanh.f32 %v676_v17  ;;  %v689_v40 = vsel %vm688_vm1, %v676_v17, %v609_v14  ;;  %v787_v14 = vld [vmem:[#allocation6 + $0x88] sm:$0xff] }
0x127e   :  { %v789_v15 = vpack.c.bf16 %v787_v14, %v786_v13 }
0x1287   :  { %v1210_v18 = vpop.eup %1209 }
0x1288   :  { %679 = vrot.lane.b32.xlu0 %v1210_v18, %s1292_s2 }
0x12fa   :  { %v680_v20 = vpop.permute.xlu0 %679 }
0x12fb   :  { %v682_v21 = vmul.f32 %v1208_v11, %v680_v20 }
0x12fd   :  { %v690_v22 = vsel %vm688_vm1, %v682_v21, %v610_v53 }
0x12fe   :  { %v691_v23 = vpack.c.bf16 %v690_v22, %v690_v22 }
0x1300   :  { %693 = vrot.lane.b32.xlu1 %v691_v23, %s1293_s16  ;;  %v1020_v23 = vld [vmem:[#allocation6 + $0x90] ss:$0 sm:$0xff] }
0x1372   :  { %v694_v24 = vpop.permute.xlu1 %693 }
0x1373   :  { %1116 = vmatmul.mubr.msk.bf16.vlgmr.msra.gmra.mrb[12].mxu1 %vm134_vm4, %v694_v24 }
0x1374   :  { %1131 = vmatprep.mubr.msk.bf16.mxu1 %vm1290_vm0, %v1289_v3  ;;  %1128 = vmatpush3.bf16.msra.mxu1 %v781_v51 }
0x1375   :  { %1129 = vmatprep.subr.bf16.mxu1 %v1289_v3 }
0x1378   :  { %1130 = vmatpush3.bf16.msra.mxu1 %v782_v60 }
0x1446   :  { %v732_v29 = vpop.f32.mrb[12].mxu1 }
0x1447   :  { %v738_v30 = vadd.f32 %v732_v29, %v133_v28  ;;  %v1117_v4 = vpop.f32.mrb[13].mxu1 }
0x1448   :  { %v735_v31 = vpop.f32.mrb[14].mxu1 }
0x1449   :  { %1211 = vtanh.f32 %v738_v30  ;;  %v1118_v32 = vpop.f32.mrb[15].mxu1  ;;  %v1015_v7 = vmul.f32 -1.442695, %v738_v30 }
0x144b   :  { %1213 = vpow2.f32 %v1015_v7 }
0x1453   :  { %v1212_v33 = vpop.eup %1211 }
0x1454   :  { %748 = vrot.lane.b32.xlu0 %v1212_v33, %s1292_s2 }
0x1455   :  { %v1214_v35 = vpop.eup %1213 }
0x1456   :  { %v742_v36 = vadd.f32 1.0, %v1214_v35 }
0x1458   :  { %766 = vperm.xlu0 %1154, %v764_v34   ;;  %1215 = vrcp.f32 %v742_v36 }
0x1462   :  { %v1216_v37 = vpop.eup %1215 }
0x1463   :  { %v746_v41 = vmul.f32 %v1216_v37, %v689_v40 }
0x14c6   :  { %v749_v38 = vpop.permute.xlu0 %748 }
0x14c7   :  { %v751_v39 = vmul.f32 %v1216_v37, %v749_v38 }
0x14c9   :  { %753 = vrot.lane.b32.xlu1 %v751_v39, %s1293_s16 }
0x14d7   :  { %v767_v52 = vpop.permute.xlu0 %766 }
0x14d8   :  { %vm768_vm2 = vcmp.eq.s32.totalorder %v767_v52, 1 }
0x153b   :  { %v754_v8 = vpop.permute.xlu1 %753 }
0x153c   :  { %v756_v42 = vadd.f32 %v754_v8, %v746_v41 }
0x153e   :  { %1217 = vtanh.f32 %v756_v42 }
0x1548   :  { %v1218_v48 = vpop.eup %1217 }
0x1549   :  { %759 = vrot.lane.b32.xlu1 %v1218_v48, %s1292_s2  ;;  %s960_s2 = sshll.u32 %s1294_s1, 4  ;;  %s961_s2 = int_to_ptr.vmem [resolvable:$true] %s960_s2 }
0x154a   :  { %p1262_p0 = scmp.lt.s32.totalorder %s961_s2, %s961_s2 }
0x15bb   :  { %v760_v53 = vpop.permute.xlu1 %759 }
0x15bc   :  { %v762_v54 = vmul.f32 %v1216_v37, %v760_v53 }
0x15be   :  { %v769_v55 = vsel %vm768_vm2, %v762_v54, %v690_v22 }
0x15bf   :  { %v791_v56 = vpack.c.bf16 %v769_v55, %v769_v55 }
0x15c1   :  { %797 = vrot.lane.b32.xlu0 %v791_v56, %s1293_s16  ;;  %s1257_s16 = scalar_lea.vmem %s961_s2, 32 }
0x15c2   :  { %p1258_p13 = scmp.ne.s32.totalorder %s961_s2, %s1257_s16  ;;  %p1263_p1 = scmp.lt.s32.totalorder %s1257_s16, %s1257_s16 }
0x15c4   :  { %p1264_p2 = por %p1263_p1, %p1262_p0 }
0x15c6   :  { %p1265_p3 = pnand %p1264_p2, %p1258_p13 }
0x1633   :  { %v798_v57 = vpop.permute.xlu0 %797 }
0x1634   :  { %1124 = vmatmul.mubr.msk.bf16.vlgmr.msra.gmra.mrb[16].mxu0 %vm134_vm4, %v798_v57 }
0x1635   :  { %1139 = vmatprep.mubr.msk.bf16.mxu0 %vm1290_vm0, %v1289_v3  ;;  %1136 = vmatpush3.bf16.msra.mxu0 %v788_v63  ;;  %vm940_vm0 = vcmask 1041408  }
0x1636   :  { %1137 = vmatprep.subr.bf16.mxu0 %v1289_v3 }
0x1639   :  { %1138 = vmatpush3.bf16.msra.mxu0 %v789_v15 }
0x1707   :  { %v836_v1 = vpop.f32.mrb[16].mxu0 }
0x1708   :  { %v837_v2 = vadd.f32 %v1016_v0, %v836_v1  ;;  %v1125_v5 = vpop.f32.mrb[17].mxu0 }
0x1709   :  { %v839_v9 = vpop.f32.mrb[18].mxu0 }
0x170a   :  { %v842_v10 = vmax.f32 %v837_v2, 0.0  ;;  %v1126_v11 = vpop.f32.mrb[19].mxu0 }
0x170c   :  { %v843_v12 = vpack.c.bf16 %v842_v10, %v842_v10 }
0x170e   :  { %1132 = vmatmul.mubr.msk.bf16.vlgmr.msra.gmra.mrb[16].mxu1 %vm134_vm4, %v843_v12 }
0x17e1   :  { %v885_v17 = vpop.f32.mrb[16].mxu1 }
0x17e2   :  { %v886_v18 = vadd.f32 %v1018_v16, %v885_v17  ;;  %v1133_v19 = vpop.f32.mrb[17].mxu1 }
0x17e3   :  { %v888_v20 = vpop.f32.mrb[18].mxu1 }
0x17e4   :  { %v891_v3 = vmax.f32 %v886_v18, 0.0  ;;  %v1134_v21 = vpop.f32.mrb[19].mxu1 }
0x17e6   :  { %v892_v22 = vpack.c.bf16 %v891_v3, %v891_v3 }
0x17e8   :  { %1140 = vmatmul.mubr.msk.bf16.vlgmr.msra.gmra.mrb[20].mxu0 %vm134_vm4, %v892_v22 }
0x18bb   :  { %v934_v24 = vpop.f32.mrb[20].mxu0 }
0x18bc   :  { %v935_v25 = vadd.f32 %v1020_v23, %v934_v24  ;;  %v1141_v26 = vpop.f32.mrb[21].mxu0 }
0x18bd   :  { %v937_v27 = vpop.f32.mrb[22].mxu0 }
0x18be   :  { %v1142_v28 = vpop.f32.mrb[23].mxu0  ;;  %v941_v29 = vsel %vm940_vm0, %v935_v25, -inf }
0x18bf   :  { %942 = vmax.xlane.f32.xlu1 %v941_v29 }
0x194c   :  { %v943_v30 = vpop.xlane.xlu1 %942 }
0x194d   :  { %v944_v4 = vsub.f32 %v935_v25, %v943_v30 }
0x194f   :  { %v945_v31 = vmul.f32 1.442695, %v944_v4 }
0x1951   :  { %1219 = vpow2.f32 %v945_v31 }
0x195b   :  { %v1220_v32 = vpop.eup %1219 }
0x195c   :  { %v947_v33 = vsel %vm940_vm0, %v1220_v32, 0.0 }
0x195d   :  { %948 = vadd.xlane.f32.xlu0 %v947_v33 }
0x19ea   :  { %v949_v34 = vpop.xlane.xlu0 %948 }
0x19eb   :  { %1221 = vlog2.f32 %v949_v34 }
0x19f5   :  { %v1222_v7 = vpop.eup %1221 }
0x19f6   :  { %v951_v35 = vmul.f32 0.6931472, %v1222_v7 }
0x19f8   :  { %v952_v36 = vsub.f32 %v944_v4, %v951_v35 }
0x19fa   :  { %953 = vst [vmem:[#allocation7] sm:$0x3] %v952_v36 }
0x19fb   :  { %1268 = shalt.err (!%p1265_p3)
}
0x19fc   :  { %s1269_s21 = scalar_lea.hbm %s1551_s4, 32 }
0x19fd   :  { %p1270_p4 = scmp.ne.s32.totalorder %s1551_s4, %s1269_s21  ;;  %p1273_p5 = scmp.lt.u32.totalorder %s1269_s21, %s1551_s4 }
0x19ff   :  { %p1275_p6 = pnand %p1273_p5, %p1270_p4 }
0x1a01   :  { %1278 = shalt.err (!%p1275_p6)
}
0x1a02   :  { %963 = dma.vmem_to_hbm [thread:$0]  %s961_s2, 32, %s1551_s4, [#allocation4]  }
0x1a03   :  { %1283 = dma.done.wait [#allocation4], 32  }
0x1a04   :  { %1284 = vsyncadd [#allocation4], 4294967264 }
0x1a05   :  { %967 = vsyncpa [#allocation3], 1 }
0x1a06   :  { %968 = vsyncpa [#allocation4], 1 }
0x1a07   :  { %969 = vsyncpa [#allocation5], 1 }

</bundles_post_ra>
